<compile_context>
chip_gen: v6e
topology: v6e:2x2x1
jax: 0.10.0
libtpu: 0.0.40
codegen_flags: <defaults>
</compile_context>

<pallas_src>
import functools

import jax
import jax.numpy as jnp
from jax.experimental import pallas as pl
from jax.experimental.pallas import tpu as pltpu


# --------------------- row-resident kernel (whole H*W row in VMEM) ----------

def _adain_rows_kernel(x_ref, wb_ref, o_ref, *, eps, inv_n):
    # x_ref / o_ref: (TR, HW) tiles; wb_ref: (TR, 2) = [weight, bias] per row.
    x = x_ref[...].astype(jnp.float32)
    mean = jnp.sum(x, axis=-1, keepdims=True) * inv_n            # (TR, 1)
    d = x - mean
    var = jnp.sum(d * d, axis=-1, keepdims=True) * inv_n         # two-pass, biased
    inv_std = jax.lax.rsqrt(var + eps)
    scale = wb_ref[:, 0:1] * inv_std                             # (TR, 1)
    shift = wb_ref[:, 1:2]                                       # (TR, 1)
    o_ref[...] = (d * scale + shift).astype(o_ref.dtype)


# --------------------- chunked path (H*W too large for a resident row) ------

def _stats_kernel(x_ref, s_ref, *, hw, tk, needs_mask):
    # Accumulate per-row [sum, sum_sq] over lane chunks.  s_ref: (TR, 2) f32.
    k = pl.program_id(1)

    @pl.when(k == 0)
    def _():
        s_ref[...] = jnp.zeros_like(s_ref)

    x = x_ref[...].astype(jnp.float32)
    if needs_mask:
        # Last chunk may extend past hw; zero the OOB lanes so they don't
        # contaminate the per-row sums.
        col = jax.lax.broadcasted_iota(jnp.int32, x.shape, 1) + k * tk
        x = jnp.where(col < hw, x, 0.0)
    s_ref[:, 0:1] += jnp.sum(x, axis=-1, keepdims=True)
    s_ref[:, 1:2] += jnp.sum(x * x, axis=-1, keepdims=True)


def _affine_kernel(x_ref, ss_ref, o_ref):
    # out = x * scale + shift with per-row constants; ss_ref: (TR, 2) f32.
    x = x_ref[...].astype(jnp.float32)
    o_ref[...] = (x * ss_ref[:, 0:1] + ss_ref[:, 1:2]).astype(o_ref.dtype)


# --------------------------------- wrapper ----------------------------------

def _round_down(v, m):
    return (v // m) * m


def _round_up(v, m):
    return -(-v // m) * m


def _vmem_budget():
    """Generation-aware (block_budget_bytes, vmem_limit_bytes)."""
    try:
        info = pltpu.get_tpu_info()
        cap = int(getattr(info, "vmem_capacity_bytes", 64 * 1024 * 1024))
    except Exception:
        cap = 64 * 1024 * 1024                      # conservative fallback
    if cap <= 64 * 1024 * 1024:                     # v7x-class: 64 MiB / TC
        return 4 * 1024 * 1024, 48 * 1024 * 1024
    return 8 * 1024 * 1024, 64 * 1024 * 1024        # v5e / v6e: 128 MiB


def adaptive_instance_norm_2d(x, weight, bias, eps=1e-5, block_budget_bytes=None):
    """x: (B, C, H, W); weight, bias: (B*C,) as in the PyTorch module."""
    b, c, h, w = x.shape
    bc = b * c
    hw = h * w
    itemsize = jnp.dtype(x.dtype).itemsize
    sublane = {4: 8, 2: 16, 1: 32}.get(itemsize, 8)   # packed sublane tile

    auto_budget, vmem_limit = _vmem_budget()
    budget = int(block_budget_bytes) if block_budget_bytes else auto_budget

    x_flat = x.reshape(bc, hw)
    w32 = weight.astype(jnp.float32).reshape(bc, 1)
    b32 = bias.astype(jnp.float32).reshape(bc, 1)

    rows_that_fit = budget // (hw * itemsize)

    # ------------------ path 1: whole spatial plane per row in VMEM ---------
    if rows_that_fit >= min(sublane, bc):
        tr = max(sublane, _round_down(rows_that_fit, sublane))
        if bc >= 2 * sublane:
            # Keep >= 2 grid steps so the 'parallel' row axis shards across
            # both v7x TensorCores.
            tr = min(tr, _round_up(-(-bc // 2), sublane))
        if tr >= bc:
            tr = bc                                   # single full-extent block
        grid = (pl.cdiv(bc, tr),)                     # ragged edge: Pallas masks

        wb = jnp.concatenate([w32, b32], axis=-1)     # (bc, 2) fused operand
        kernel = functools.partial(_adain_rows_kernel,
                                   eps=float(eps), inv_n=1.0 / float(hw))
        out_flat = pl.pallas_call(
            kernel,
            out_shape=jax.ShapeDtypeStruct((bc, hw), x.dtype),
            grid_spec=pltpu.PrefetchScalarGridSpec(
                num_scalar_prefetch=0,
                grid=grid,
                in_specs=[
                    pl.BlockSpec((tr, hw), lambda i: (i, 0)),   # x rows
                    pl.BlockSpec((tr, 2), lambda i: (i, 0)),    # [weight, bias]
                ],
                out_specs=pl.BlockSpec((tr, hw), lambda i: (i, 0)),
            ),
            compiler_params=pltpu.CompilerParams(
                dimension_semantics=("parallel",),
                vmem_limit_bytes=vmem_limit),
        )(x_flat, wb)
        return out_flat.reshape(b, c, h, w)

    # ------------------ path 2: H*W chunked (very large feature maps) -------
    # Pass 1: per-row [sum, sum_sq] reduced over lane chunks.
    # Pass 2: per-row affine with scale/shift folded from stats + weight/bias.
    tr = min(bc, 64)
    if tr >= sublane:
        tr = _round_down(tr, sublane)
        if bc >= 2 * sublane:
            tr = min(tr, _round_up(-(-bc // 2), sublane))   # >= 2 row blocks
    else:
        tr = bc                                             # full-extent rows
    tk = max(128, _round_down(budget // (tr * itemsize), 128))
    tk = min(tk, _round_down(hw, 128)) if hw >= 128 else hw
    n_rb = pl.cdiv(bc, tr)
    n_k = pl.cdiv(hw, tk)
    needs_mask = (hw % tk) != 0

    stats = pl.pallas_call(
        functools.partial(_stats_kernel, hw=hw, tk=tk, needs_mask=needs_mask),
        out_shape=jax.ShapeDtypeStruct((bc, 2), jnp.float32),
        grid_spec=pltpu.PrefetchScalarGridSpec(
            num_scalar_prefetch=0,
            grid=(n_rb, n_k),
            in_specs=[pl.BlockSpec((tr, tk), lambda i, k: (i, k))],
            out_specs=pl.BlockSpec((tr, 2), lambda i, k: (i, 0)),
        ),
        compiler_params=pltpu.CompilerParams(
            dimension_semantics=("parallel", "arbitrary"),
            vmem_limit_bytes=vmem_limit),
    )(x_flat)

    # Tiny (bc, 2) finalize in plain JAX: fold stats + weight/bias into
    # per-row scale/shift for the affine pass.
    inv_n = 1.0 / float(hw)
    mean = stats[:, 0:1] * inv_n
    var = jnp.maximum(stats[:, 1:2] * inv_n - mean * mean, 0.0)
    inv_std = jax.lax.rsqrt(var + float(eps))
    scale = w32 * inv_std
    shift = b32 - mean * scale
    ss = jnp.concatenate([scale, shift], axis=-1)            # (bc, 2)

    out_flat = pl.pallas_call(
        _affine_kernel,
        out_shape=jax.ShapeDtypeStruct((bc, hw), x.dtype),
        grid_spec=pltpu.PrefetchScalarGridSpec(
            num_scalar_prefetch=0,
            grid=(n_rb, n_k),
            in_specs=[
                pl.BlockSpec((tr, tk), lambda i, k: (i, k)),
                pl.BlockSpec((tr, 2), lambda i, k: (i, 0)),
            ],
            out_specs=pl.BlockSpec((tr, tk), lambda i, k: (i, k)),
        ),
        compiler_params=pltpu.CompilerParams(
            dimension_semantics=("parallel", "parallel"),
            vmem_limit_bytes=vmem_limit),
    )(x_flat, ss)

    # TODO(synk): running_mean / running_var momentum-EMA buffer updates are a
    # stateful PyTorch side-effect; they do not affect the forward output.
    return out_flat.reshape(b, c, h, w)


# --------------------------------- reference ---------------------------------

def _reference(x, weight, bias, eps=1e-5):
    b, c, h, w = x.shape
    xr = x.reshape(b * c, h * w).astype(jnp.float32)
    mean = xr.mean(axis=1, keepdims=True)
    var = ((xr - mean) ** 2).mean(axis=1, keepdims=True)
    out = (xr - mean) / jnp.sqrt(var + eps)
    out = out * weight.astype(jnp.float32)[:, None] + bias.astype(jnp.float32)[:, None]
    return out.reshape(b, c, h, w).astype(x.dtype)


if __name__ == "__main__":
    key = jax.random.PRNGKey(0)

    # --- test 1: shapes implied by the module (single-block resident path) --
    B, C, H, W = 2, 4, 16, 16
    kx, kw, kb, key = jax.random.split(key, 4)
    x = jax.random.normal(kx, (B, C, H, W), dtype=jnp.float32)
    weight = jax.random.normal(kw, (B * C,), dtype=jnp.float32) * 0.5 + 1.0
    bias = jax.random.normal(kb, (B * C,), dtype=jnp.float32) * 0.1

    out = jax.block_until_ready(adaptive_instance_norm_2d(x, weight, bias, eps=1e-5))
    ref = _reference(x, weight, bias, eps=1e-5)
    assert out.shape == (B, C, H, W)
    assert jnp.allclose(out, ref, atol=1e-4, rtol=1e-4), "mismatch vs reference (test 1)"

    # --- test 2: ragged B*C -> partial edge row block, no pad / no slice ----
    B2, C2, H2, W2 = 3, 7, 8, 16          # bc = 21, tr capped at 16 -> 2 steps
    kx2, kw2, kb2, key = jax.random.split(key, 4)
    x2 = jax.random.normal(kx2, (B2, C2, H2, W2), dtype=jnp.float32)
    w2 = jax.random.normal(kw2, (B2 * C2,), dtype=jnp.float32) * 0.5 + 1.0
    b2 = jax.random.normal(kb2, (B2 * C2,), dtype=jnp.float32) * 0.1

    out2 = jax.block_until_ready(adaptive_instance_norm_2d(x2, w2, b2, eps=1e-5))
    ref2 = _reference(x2, w2, b2, eps=1e-5)
    assert out2.shape == (B2, C2, H2, W2)
    assert jnp.allclose(out2, ref2, atol=1e-4, rtol=1e-4), "mismatch vs reference (test 2)"

    # --- test 3: force the chunked large-H*W path (tiny block budget) -------
    B3, C3, H3, W3 = 2, 3, 64, 64         # bc = 6, hw = 4096
    kx3, kw3, kb3, key = jax.random.split(key, 4)
    x3 = jax.random.normal(kx3, (B3, C3, H3, W3), dtype=jnp.float32)
    w3 = jax.random.normal(kw3, (B3 * C3,), dtype=jnp.float32) * 0.5 + 1.0
    b3 = jax.random.normal(kb3, (B3 * C3,), dtype=jnp.float32) * 0.1

    out3 = jax.block_until_ready(
        adaptive_instance_norm_2d(x3, w3, b3, eps=1e-5, block_budget_bytes=64 * 1024))
    ref3 = _reference(x3, w3, b3, eps=1e-5)
    assert out3.shape == (B3, C3, H3, W3)
    assert jnp.allclose(out3, ref3, atol=1e-4, rtol=1e-4), "mismatch vs reference (test 3)"

    print("KERNEL_OK")
</pallas_src>

<mosaic_0001>
module attributes {stable_mosaic.version = 11 : i64} {
  func.func @_adain_rows_kernel(%arg0: i32, %arg1: memref<8x256xf32, #tpu.memory_space<vmem>>, %arg2: memref<8x2xf32, #tpu.memory_space<vmem>>, %arg3: memref<8x256xf32, #tpu.memory_space<vmem>>) attributes {dimension_semantics = [#tpu.dimension_semantics<parallel>], iteration_bounds = array<i64: 1>, scalar_prefetch = 0 : i64, scratch_operands = 0 : i64, tpu.core_type = #tpu.core_type<tc>, window_params = [{transform_indices = @transform_0, window_bounds = array<i64: 8, 256>}, {transform_indices = @transform_1, window_bounds = array<i64: 8, 2>}, {transform_indices = @transform_2, window_bounds = array<i64: 8, 256>}]} {
    %c0 = arith.constant 0 : index
    %c0_0 = arith.constant 0 : index
    %0 = vector.load %arg1[%c0, %c0_0] : memref<8x256xf32, #tpu.memory_space<vmem>>, vector<8x256xf32>
    %cst = arith.constant dense<0.000000e+00> : vector<8xf32>
    %1 = vector.multi_reduction <add>, %0, %cst [1] : vector<8x256xf32> to vector<8xf32>
    %2 = vector.shape_cast %1 : vector<8xf32> to vector<8x1xf32>
    %cst_1 = arith.constant 3.906250e-03 : f32
    %3 = vector.broadcast %cst_1 : f32 to vector<8x1xf32>
    %4 = arith.mulf %2, %3 : vector<8x1xf32>
    %5 = vector.broadcast %4 : vector<8x1xf32> to vector<8x256xf32>
    %6 = arith.subf %0, %5 : vector<8x256xf32>
    %7 = arith.mulf %6, %6 : vector<8x256xf32>
    %cst_2 = arith.constant dense<0.000000e+00> : vector<8xf32>
    %8 = vector.multi_reduction <add>, %7, %cst_2 [1] : vector<8x256xf32> to vector<8xf32>
    %9 = vector.shape_cast %8 : vector<8xf32> to vector<8x1xf32>
    %cst_3 = arith.constant 3.906250e-03 : f32
    %10 = vector.broadcast %cst_3 : f32 to vector<8x1xf32>
    %11 = arith.mulf %9, %10 : vector<8x1xf32>
    %cst_4 = arith.constant 9.99999974E-6 : f32
    %12 = vector.broadcast %cst_4 : f32 to vector<8x1xf32>
    %13 = arith.addf %11, %12 : vector<8x1xf32>
    %14 = math.rsqrt %13 : vector<8x1xf32>
    %c0_5 = arith.constant 0 : index
    %c0_6 = arith.constant 0 : index
    %15 = vector.load %arg2[%c0_5, %c0_6] : memref<8x2xf32, #tpu.memory_space<vmem>>, vector<8x1xf32>
    %16 = arith.mulf %15, %14 : vector<8x1xf32>
    %c0_7 = arith.constant 0 : index
    %c1 = arith.constant 1 : index
    %17 = vector.load %arg2[%c0_7, %c1] : memref<8x2xf32, #tpu.memory_space<vmem>>, vector<8x1xf32>
    %18 = vector.broadcast %16 : vector<8x1xf32> to vector<8x256xf32>
    %19 = arith.mulf %6, %18 : vector<8x256xf32>
    %20 = vector.broadcast %17 : vector<8x1xf32> to vector<8x256xf32>
    %21 = arith.addf %19, %20 : vector<8x256xf32>
    %c0_8 = arith.constant 0 : index
    %c0_9 = arith.constant 0 : index
    %22 = vector.load %arg3[%c0_8, %c0_9] : memref<8x256xf32, #tpu.memory_space<vmem>>, vector<8x256xf32>
    tpu.vector_store %arg3[%c0_8, %c0_9], %21 {strides = array<i32>} : memref<8x256xf32, #tpu.memory_space<vmem>>, vector<8x256xf32>,
    return
  }
  func.func @transform_0(%arg0: i32) -> (i32, i32) {
    %c0_i32 = arith.constant 0 : i32
    %c0_i32_0 = arith.constant 0 : i32
    return %arg0, %c0_i32 : i32, i32
  }
  func.func @transform_1(%arg0: i32) -> (i32, i32) {
    %c0_i32 = arith.constant 0 : i32
    %c0_i32_0 = arith.constant 0 : i32
    return %arg0, %c0_i32 : i32, i32
  }
  func.func @transform_2(%arg0: i32) -> (i32, i32) {
    %c0_i32 = arith.constant 0 : i32
    %c0_i32_0 = arith.constant 0 : i32
    return %arg0, %c0_i32 : i32, i32
  }
}

</mosaic_0001>

<bundles_post_ra>
// kernel: tpu_custom_call.1
= control target key start
LH: loop header
LB: loop body
LE: loop exit
PB: predicated region body
PF: predicated region fallthrough
CT: control target
= control target key end

     0   :  { %7 = vsyncpa [#allocation3], 0  ;;  %s154_s0 = inlined_call_operand.hbm [shape: f32[8,256], index: 0, kind: input, shape index: {}]   ;;  %s155_s1 = inlined_call_operand.vmem [shape: f32[8,2], index: 1, kind: input, shape index: {}]   ;;  %s156_s2 = inlined_call_operand.hbm [shape: f32[8,256], index: 2, kind: output, shape index: {}]  }
   0x1   :  { %8 = vsyncpa [#allocation4], 0  ;;  %s126_s9 = smov [#allocation2]  }
   0x2   :  { %s15_s10 = sshll.u32 %s126_s9, 4  ;;  %s16_s10 = int_to_ptr.vmem [resolvable:$true] %s15_s10 }
   0x3   :  { %s90_s11 = scalar_lea.vmem %s16_s10, 256  ;;  %p95_p1 = scmp.lt.s32.totalorder %s16_s10, %s16_s10 }
   0x4   :  { %p91_p0 = scmp.ne.s32.totalorder %s16_s10, %s90_s11  ;;  %p96_p2 = scmp.lt.s32.totalorder %s90_s11, %s90_s11 }
   0x6   :  { %p97_p3 = por %p96_p2, %p95_p1 }
   0x8   :  { %p98_p4 = pnand %p97_p3, %p91_p0 }
   0xa   :  { %101 = shalt.err (!%p98_p4)
}
   0xb   :  { %18 = dma.hbm_to_vmem [thread:$0]  %s154_s0, 256, %s16_s10, [#allocation3]  }
   0xc   :  { %122 = dma.done.wait [#allocation3], 256  }
   0xd   :  { %123 = vsyncadd [#allocation3], 4294967040  ;;  %v24_v0 = vld [vmem:[#allocation2] sm:$0xff]  ;;  %v25_v1 = vld [vmem:[#allocation2 + $0x8] sm:$0xff]  ;;  %v127_v10 = vmov 0   ;;  %v128_v11 = vmov 1  }
   0xe   :  { %v26_v2 = vadd.f32 %v25_v1, %v24_v0  ;;  %77 = vset.pattern.permute.xlu1 %v127_v10  ;;  %79 = vset.pattern.permute.xlu0 %v128_v11  ;;  %v40_v15 = vld [vmem:[%s155_s1] sm:$0xff]  ;;  %s129_s15 = smov [#allocation5]  }
   0xf   :  { %s64_s16 = sshll.u32 %s129_s15, 4  ;;  %s65_s16 = int_to_ptr.vmem [resolvable:$true] %s64_s16 }
  0x10   :  { %27 = vadd.xlane.f32.xlu0 %v26_v2  ;;  %s102_s17 = scalar_lea.vmem %s65_s16, 256  ;;  %p107_p6 = scmp.lt.s32.totalorder %s65_s16, %s65_s16 }
  0x11   :  { %p103_p5 = scmp.ne.s32.totalorder %s65_s16, %s102_s17  ;;  %p108_p7 = scmp.lt.s32.totalorder %s102_s17, %s102_s17 }
  0x13   :  { %p109_p8 = por %p108_p7, %p107_p6 }
  0x15   :  { %p110_p9 = pnand %p109_p8, %p103_p5 }
  0x99   :  { %v28_v3 = vpop.xlane.xlu0 %27 }
  0x9a   :  { %v29_v4 = vmul.f32 0.00390625, %v28_v3 }
  0x9c   :  { %v30_v5 = vsub.f32 %v24_v0, %v29_v4  ;;  %v31_v6 = vsub.f32 %v25_v1, %v29_v4 }
  0x9e   :  { %v32_v7 = vmul.f32 %v30_v5, %v30_v5  ;;  %v33_v8 = vmul.f32 %v31_v6, %v31_v6 }
  0xa0   :  { %v34_v9 = vadd.f32 %v33_v8, %v32_v7 }
  0xa2   :  { %35 = vadd.xlane.f32.xlu0 %v34_v9 }
 0x12b   :  { %v36_v12 = vpop.xlane.xlu0 %35 }
 0x12c   :  { %v37_v13 = vmul.f32 0.00390625, %v36_v12 }
 0x12e   :  { %v38_v14 = vadd.f32 1e-05, %v37_v13 }
 0x130   :  { %80 = vrsqrt.f32 %v38_v14 }
 0x13d   :  { %v81_v16 = vpop.eup %80 }
 0x13e   :  { %v41_v17 = vmul.f32 %v81_v16, %v40_v15 }
 0x140   :  { %44 = vperm.xlu1 %77, %v41_v17  }
 0x144   :  { %78 = vset.pattern.permute.xlu1 %v128_v11 }
 0x145   :  { %51 = vperm.xlu1 %78, %v40_v15  }
 0x1bb   :  { %v45_v18 = vpop.permute.xlu1 %44 }
 0x1bc   :  { %v47_v19 = vmul.f32 %v45_v18, %v30_v5  ;;  %v48_v20 = vmul.f32 %v45_v18, %v31_v6 }
 0x1c0   :  { %v52_v21 = vpop.permute.xlu1 %51 }
 0x1c1   :  { %v54_v22 = vadd.f32 %v52_v21, %v47_v19  ;;  %v55_v23 = vadd.f32 %v52_v21, %v48_v20 }
 0x1c3   :  { %56 = vst [vmem:[#allocation5] sm:$0xff] %v54_v22  ;;  %57 = vst [vmem:[#allocation5 + $0x8] sm:$0xff] %v55_v23 }
 0x1c4   :  { %113 = shalt.err (!%p110_p9)
}
 0x1c5   :  { %67 = dma.vmem_to_hbm [thread:$0]  %s65_s16, 256, %s156_s2, [#allocation4]  }
 0x1c6   :  { %124 = dma.done.wait [#allocation4], 256  }
 0x1c7   :  { %125 = vsyncadd [#allocation4], 4294967040 }
 0x1c8   :  { %71 = vsyncpa [#allocation3], 1 }
 0x1c9   :  { %72 = vsyncpa [#allocation4], 1 }

</bundles_post_ra>
